<compile_context>
chip_gen: v5e
topology: v5e:2x2
jax: 0.10.0
libtpu: 0.0.40
codegen_flags: <defaults>
</compile_context>

<pallas_src>
import jax
import jax.numpy as jnp
from jax.experimental import pallas as pl
from jax.experimental.pallas import tpu as pltpu


def _round_up(a, m):
    return (a + m - 1) // m * m


def _choose_tn(O, H, dtype_bytes=2, max_tile_bytes=8 << 20):
    """Output (N) tile width: full O if the resident W2 block is small, else
    the largest 128-multiple that divides O and keeps H*tn under budget."""
    if H * O * dtype_bytes <= max_tile_bytes or O % 128 != 0:
        return O
    cap = max(128, (max_tile_bytes // (H * dtype_bytes)) // 128 * 128)
    tn = min(cap, O)
    while tn > 128 and O % tn != 0:
        tn -= 128
    return tn if O % tn == 0 else O  # fallback: no N tiling


def _vmem_bytes_estimate(tm, tn, D, H):
    """Conservative VMEM footprint: every BlockSpec operand assumed
    double-buffered, plus the h scratch."""
    bf, f32 = 2, 4
    return (2 * tm * D * bf          # x tiles
            + 2 * D * H * bf         # W1
            + 2 * H * f32            # b1
            + 2 * H * tn * bf        # W2 tile
            + 2 * tn * f32           # b2 tile
            + 2 * tm * tn * f32      # out tiles
            + tm * H * bf)           # h scratch


def _kernel_fused(x_ref, w1_ref, b1_ref, w2_ref, b2_ref, out_ref):
    """Whole MLP for one batch tile; hidden activation stays in registers."""
    h = jnp.dot(x_ref[...], w1_ref[...], preferred_element_type=jnp.float32)
    h = jnp.maximum(h + b1_ref[...], 0.0)
    o = jnp.dot(h.astype(jnp.bfloat16), w2_ref[...],
                preferred_element_type=jnp.float32)
    out_ref[...] = (o + b2_ref[...]).astype(out_ref.dtype)


def _kernel_ntiled(x_ref, w1_ref, b1_ref, w2_ref, b2_ref, out_ref, h_ref):
    """N-tiled variant: compute h once per batch tile (j == 0), cache in VMEM."""
    @pl.when(pl.program_id(1) == 0)
    def _():
        h = jnp.dot(x_ref[...], w1_ref[...],
                    preferred_element_type=jnp.float32)
        h = jnp.maximum(h + b1_ref[...], 0.0)
        h_ref[...] = h.astype(h_ref.dtype)

    o = jnp.dot(h_ref[...], w2_ref[...], preferred_element_type=jnp.float32)
    out_ref[...] = (o + b2_ref[...]).astype(out_ref.dtype)


def latent_transform(x, w1, b1, w2, b2, *, output_frame, latent_dim):
    """x: (B, latent_dim) -> (B, output_frame, latent_dim).

    w1: (D, 2D), b1: (1, 2D), w2: (2D, D*F), b2: (1, D*F)
    (nn.Linear weights pre-transposed so the kernel computes x @ W + b)."""
    B, D = x.shape
    assert D == latent_dim
    H = 2 * latent_dim
    O = latent_dim * output_frame
    assert w1.shape == (D, H) and b1.shape == (1, H)
    assert w2.shape == (H, O) and b2.shape == (1, O)

    out_dtype = x.dtype

    # bf16 MXU feeds; biases stay f32 (added onto the f32 accumulator).
    xb = x.astype(jnp.bfloat16)
    w1b = w1.astype(jnp.bfloat16)
    w2b = w2.astype(jnp.bfloat16)
    b1f = b1.astype(jnp.float32)
    b2f = b2.astype(jnp.float32)

    # ---- tiling ----
    tm = min(512, _round_up(B, 8))      # MXU-friendly batch tile
    Bp = _round_up(B, tm)
    if Bp != B:
        xb = jnp.pad(xb, ((0, Bp - B), (0, 0)))
    tn = _choose_tn(O, H)
    n_b = Bp // tm
    n_n = O // tn

    vmem_limit = int(min(64 << 20,
                         max(16 << 20, 2 * _vmem_bytes_estimate(tm, tn, D, H))))

    cost = pl.CostEstimate(
        flops=2 * Bp * (D * H + H * O),
        transcendentals=0,
        bytes_accessed=(Bp * D * 2 + D * H * 2 + H * O * 2
                        + H * 4 + O * 4
                        + Bp * O * jnp.dtype(out_dtype).itemsize),
    )

    batch_sem = "parallel" if n_b > 1 else "arbitrary"

    if n_n == 1:
        # Fast path: single grid axis, no scratch, no branch.
        out_flat = pl.pallas_call(
            _kernel_fused,
            out_shape=jax.ShapeDtypeStruct((Bp, O), out_dtype),
            grid_spec=pltpu.PrefetchScalarGridSpec(
                num_scalar_prefetch=0,
                grid=(n_b,),
                in_specs=[
                    pl.BlockSpec((tm, D), lambda i: (i, 0)),   # x: stream batch
                    pl.BlockSpec((D, H), lambda i: (0, 0)),    # W1: resident
                    pl.BlockSpec((1, H), lambda i: (0, 0)),    # b1: resident
                    pl.BlockSpec((H, O), lambda i: (0, 0)),    # W2: resident
                    pl.BlockSpec((1, O), lambda i: (0, 0)),    # b2: resident
                ],
                out_specs=pl.BlockSpec((tm, O), lambda i: (i, 0)),
            ),
            compiler_params=pltpu.CompilerParams(
                dimension_semantics=(batch_sem,),
                vmem_limit_bytes=vmem_limit,
            ),
            cost_estimate=cost,
        )(xb, w1b, b1f, w2b, b2f)
    else:
        # General path: W2 N-tiled; h cached across N tiles.
        out_flat = pl.pallas_call(
            _kernel_ntiled,
            out_shape=jax.ShapeDtypeStruct((Bp, O), out_dtype),
            grid_spec=pltpu.PrefetchScalarGridSpec(
                num_scalar_prefetch=0,
                grid=(n_b, n_n),
                in_specs=[
                    pl.BlockSpec((tm, D), lambda i, j: (i, 0)),   # x
                    pl.BlockSpec((D, H), lambda i, j: (0, 0)),    # W1
                    pl.BlockSpec((1, H), lambda i, j: (0, 0)),    # b1
                    pl.BlockSpec((H, tn), lambda i, j: (0, j)),   # W2 tile
                    pl.BlockSpec((1, tn), lambda i, j: (0, j)),   # b2 tile
                ],
                out_specs=pl.BlockSpec((tm, tn), lambda i, j: (i, j)),
                scratch_shapes=[pltpu.VMEM((tm, H), jnp.bfloat16)],  # cached h
            ),
            compiler_params=pltpu.CompilerParams(
                dimension_semantics=(batch_sem, "arbitrary"),
                vmem_limit_bytes=vmem_limit,
            ),
            cost_estimate=cost,
        )(xb, w1b, b1f, w2b, b2f)

    out_flat = out_flat[:B]
    # view(-1, output_frame, latent_dim) — pure reshape, done in plain JAX.
    return out_flat.reshape(-1, output_frame, latent_dim)


def init_params(key, latent_dim, output_frame, dtype=jnp.float32):
    """Deterministic synthetic parameters matching nn.Linear shapes
    (stored pre-transposed as (in, out))."""
    k1, k2, k3, k4 = jax.random.split(key, 4)
    H = latent_dim * 2
    O = latent_dim * output_frame
    bound1 = 1.0 / (latent_dim ** 0.5)
    bound2 = 1.0 / (H ** 0.5)
    w1 = jax.random.uniform(k1, (latent_dim, H), dtype, -bound1, bound1)
    b1 = jax.random.uniform(k2, (1, H), dtype, -bound1, bound1)
    w2 = jax.random.uniform(k3, (H, O), dtype, -bound2, bound2)
    b2 = jax.random.uniform(k4, (1, O), dtype, -bound2, bound2)
    return w1, b1, w2, b2


def reference(x, w1, b1, w2, b2, output_frame, latent_dim):
    h = jnp.maximum(x @ w1 + b1, 0.0)
    o = h @ w2 + b2
    return o.reshape(-1, output_frame, latent_dim)


if __name__ == "__main__":
    latent_dim = 128
    output_frame = 3
    batch = 8

    key = jax.random.PRNGKey(0)
    kx, kp = jax.random.split(key)
    x = jax.random.normal(kx, (batch, latent_dim), jnp.float32)
    w1, b1, w2, b2 = init_params(kp, latent_dim, output_frame)

    out = latent_transform(x, w1, b1, w2, b2,
                           output_frame=output_frame, latent_dim=latent_dim)
    out = jax.block_until_ready(out)

    ref = reference(x, w1, b1, w2, b2, output_frame, latent_dim)
    assert out.shape == (batch, output_frame, latent_dim), out.shape
    # bf16 MXU operands (f32 accumulation) -> relaxed tolerance vs f32 reference.
    assert jnp.allclose(out.astype(jnp.float32), ref, atol=5e-2, rtol=5e-2), (
        float(jnp.max(jnp.abs(out.astype(jnp.float32) - ref))))

    print("KERNEL_OK")
</pallas_src>

<mosaic_0001>
module attributes {stable_mosaic.version = 11 : i64} {
  func.func @_kernel_fused(%arg0: i32, %arg1: memref<8x128xbf16, #tpu.memory_space<vmem>>, %arg2: memref<128x256xbf16, #tpu.memory_space<vmem>>, %arg3: memref<1x256xf32, #tpu.memory_space<vmem>>, %arg4: memref<256x384xbf16, #tpu.memory_space<vmem>>, %arg5: memref<1x384xf32, #tpu.memory_space<vmem>>, %arg6: memref<8x384xf32, #tpu.memory_space<vmem>>) attributes {dimension_semantics = [#tpu.dimension_semantics<arbitrary>], iteration_bounds = array<i64: 1>, scalar_prefetch = 0 : i64, scratch_operands = 0 : i64, tpu.core_type = #tpu.core_type<tc>, window_params = [{transform_indices = @transform_0, window_bounds = array<i64: 8, 128>}, {pipeline_mode = #tpu.pipeline_mode<synchronous>, transform_indices = @transform_1, window_bounds = array<i64: 128, 256>}, {pipeline_mode = #tpu.pipeline_mode<synchronous>, transform_indices = @transform_2, window_bounds = array<i64: 1, 256>}, {pipeline_mode = #tpu.pipeline_mode<synchronous>, transform_indices = @transform_3, window_bounds = array<i64: 256, 384>}, {pipeline_mode = #tpu.pipeline_mode<synchronous>, transform_indices = @transform_4, window_bounds = array<i64: 1, 384>}, {transform_indices = @transform_5, window_bounds = array<i64: 8, 384>}]} {
    %c0 = arith.constant 0 : index
    %c0_0 = arith.constant 0 : index
    %0 = vector.load %arg1[%c0, %c0_0] : memref<8x128xbf16, #tpu.memory_space<vmem>>, vector<8x128xbf16>
    %c0_1 = arith.constant 0 : index
    %c0_2 = arith.constant 0 : index
    %1 = vector.load %arg2[%c0_1, %c0_2] : memref<128x256xbf16, #tpu.memory_space<vmem>>, vector<128x256xbf16>
    %cst = arith.constant dense<0.000000e+00> : vector<8x256xf32>
    %2 = tpu.matmul %0, %1, %cst {dimension_numbers = #tpu.dot_dimension_numbers<[1], [0], [0], [1], [0, 0, 1, 1], [], []>} : vector<8x128xbf16>, vector<128x256xbf16>, vector<8x256xf32> -> vector<8x256xf32>
    %c0_3 = arith.constant 0 : index
    %c0_4 = arith.constant 0 : index
    %3 = vector.load %arg3[%c0_3, %c0_4] : memref<1x256xf32, #tpu.memory_space<vmem>>, vector<1x256xf32>
    %4 = vector.broadcast %3 : vector<1x256xf32> to vector<8x256xf32>
    %5 = arith.addf %2, %4 : vector<8x256xf32>
    %cst_5 = arith.constant 0.000000e+00 : f32
    %6 = vector.broadcast %cst_5 : f32 to vector<8x256xf32>
    %7 = arith.maximumf %5, %6 : vector<8x256xf32>
    %8 = arith.truncf %7 : vector<8x256xf32> to vector<8x256xbf16>
    %c0_6 = arith.constant 0 : index
    %c0_7 = arith.constant 0 : index
    %9 = vector.load %arg4[%c0_6, %c0_7] : memref<256x384xbf16, #tpu.memory_space<vmem>>, vector<256x384xbf16>
    %cst_8 = arith.constant dense<0.000000e+00> : vector<8x384xf32>
    %10 = tpu.matmul %8, %9, %cst_8 {dimension_numbers = #tpu.dot_dimension_numbers<[1], [0], [0], [1], [0, 0, 1, 1], [], []>} : vector<8x256xbf16>, vector<256x384xbf16>, vector<8x384xf32> -> vector<8x384xf32>
    %c0_9 = arith.constant 0 : index
    %c0_10 = arith.constant 0 : index
    %11 = vector.load %arg5[%c0_9, %c0_10] : memref<1x384xf32, #tpu.memory_space<vmem>>, vector<1x384xf32>
    %12 = vector.broadcast %11 : vector<1x384xf32> to vector<8x384xf32>
    %13 = arith.addf %10, %12 : vector<8x384xf32>
    %c0_11 = arith.constant 0 : index
    %c0_12 = arith.constant 0 : index
    %14 = vector.load %arg6[%c0_11, %c0_12] : memref<8x384xf32, #tpu.memory_space<vmem>>, vector<8x384xf32>
    tpu.vector_store %arg6[%c0_11, %c0_12], %13 {strides = array<i32>} : memref<8x384xf32, #tpu.memory_space<vmem>>, vector<8x384xf32>,
    return
  }
  func.func @transform_0(%arg0: i32) -> (i32, i32) {
    %c0_i32 = arith.constant 0 : i32
    %c0_i32_0 = arith.constant 0 : i32
    return %arg0, %c0_i32 : i32, i32
  }
  func.func @transform_1(%arg0: i32) -> (i32, i32) {
    %c0_i32 = arith.constant 0 : i32
    %c0_i32_0 = arith.constant 0 : i32
    %c0_i32_1 = arith.constant 0 : i32
    return %c0_i32, %c0_i32_0 : i32, i32
  }
  func.func @transform_2(%arg0: i32) -> (i32, i32) {
    %c0_i32 = arith.constant 0 : i32
    %c0_i32_0 = arith.constant 0 : i32
    %c0_i32_1 = arith.constant 0 : i32
    return %c0_i32, %c0_i32_0 : i32, i32
  }
  func.func @transform_3(%arg0: i32) -> (i32, i32) {
    %c0_i32 = arith.constant 0 : i32
    %c0_i32_0 = arith.constant 0 : i32
    %c0_i32_1 = arith.constant 0 : i32
    return %c0_i32, %c0_i32_0 : i32, i32
  }
  func.func @transform_4(%arg0: i32) -> (i32, i32) {
    %c0_i32 = arith.constant 0 : i32
    %c0_i32_0 = arith.constant 0 : i32
    %c0_i32_1 = arith.constant 0 : i32
    return %c0_i32, %c0_i32_0 : i32, i32
  }
  func.func @transform_5(%arg0: i32) -> (i32, i32) {
    %c0_i32 = arith.constant 0 : i32
    %c0_i32_0 = arith.constant 0 : i32
    return %arg0, %c0_i32 : i32, i32
  }
}

</mosaic_0001>

<bundles_post_ra>
// kernel: tpu_custom_call.1
= control target key start
LH: loop header
LB: loop body
LE: loop exit
PB: predicated region body
PF: predicated region fallthrough
CT: control target
= control target key end

     0   :  { %10 = vsyncpa [#allocation3], 0  ;;  %s1155_s0 = inlined_call_operand.hbm [shape: bf16[8,128], index: 0, kind: input, shape index: {}]   ;;  %s1156_s1 = inlined_call_operand.hbm [shape: bf16[128,256], index: 1, kind: input, shape index: {}]   ;;  %s1157_s2 = inlined_call_operand.hbm [shape: f32[1,256], index: 2, kind: input, shape index: {}]   ;;  %s1158_s3 = inlined_call_operand.hbm [shape: bf16[256,384], index: 3, kind: input, shape index: {}]   ;;  %s1159_s4 = inlined_call_operand.vmem [shape: f32[1,384], index: 4, kind: input, shape index: {}]   ;;  %s1160_s5 = inlined_call_operand.hbm [shape: f32[8,384], index: 5, kind: output, shape index: {}]  }
   0x1   :  { %11 = vsyncpa [#allocation6], 0 }
   0x2   :  { %12 = vsyncpa [#allocation9], 0  ;;  %s29_s20 = sshll.u32 %s1156_s1, 4  ;;  %s30_s20 = int_to_ptr.hbm [resolvable:$true] %s29_s20 }
   0x3   :  { %13 = vsyncpa [#allocation4], 0  ;;  %s1098_s21 = smov [#allocation5]   ;;  %s19_s25 = sshll.u32 %s1155_s0, 4  ;;  %s20_s25 = int_to_ptr.hbm [resolvable:$true] %s19_s25 }
   0x4   :  { %s31_s22 = sshll.u32 %s1098_s21, 4  ;;  %s1099_s26 = smov 128   ;;  %s32_s22 = int_to_ptr.vmem [resolvable:$true] %s31_s22 }
   0x5   :  { %s1100_s27 = smov 8   ;;  %s1101_s28 = smov [#allocation2]  }
   0x6   :  { %37 = dma.hbm_to_vmem [thread:$0]  %s30_s20, 2048, %s32_s22, [#allocation6], %s1099_s26, %s1099_s26, %s1100_s27  }
   0x7   :  { %s21_s29 = sshll.u32 %s1101_s28, 4  ;;  %s43_s7 = sshll.u32 %s1157_s2, 4  ;;  %s22_s29 = int_to_ptr.vmem [resolvable:$true] %s21_s29  ;;  %s44_s7 = int_to_ptr.hbm [resolvable:$true] %s43_s7 }
   0x8   :  { %24 = dma.hbm_to_vmem [thread:$0]  %s20_s25, 64, %s22_s29, [#allocation3]  }
   0x9   :  { %s53_s9 = sshll.u32 %s1158_s3, 4  ;;  %s1102_s10 = smov [#allocation7]   ;;  %s54_s9 = int_to_ptr.hbm [resolvable:$true] %s53_s9 }
   0xa   :  { %s45_s11 = sshll.u32 %s1102_s10, 4  ;;  %s1103_s0 = smov [#allocation8]   ;;  %s46_s11 = int_to_ptr.vmem [resolvable:$true] %s45_s11 }
   0xb   :  { %48 = dma.hbm_to_vmem [thread:$0]  %s44_s7, 32, %s46_s11, [#allocation6]  }
   0xc   :  { %s55_s12 = sshll.u32 %s1103_s0, 4  ;;  %s1104_s13 = smov 192   ;;  %s56_s12 = int_to_ptr.vmem [resolvable:$true] %s55_s12 }
   0xd   :  { %s1105_s14 = smov 12  }
   0xe   :  { %61 = dma.hbm_to_vmem [thread:$0]  %s54_s9, 6144, %s56_s12, [#allocation9], %s1104_s13, %s1104_s13, %s1105_s14  }
   0xf   :  { %1090 = dma.done.wait [#allocation3], 64  }
  0x10   :  { %1091 = vsyncadd [#allocation3], 4294967232 }
  0x11   :  { %1092 = dma.done.wait [#allocation6], 2080  }
  0x12   :  { %1093 = vsyncadd [#allocation6], 4294965216 }
  0x13   :  { %1094 = dma.done.wait [#allocation9], 6144  }
  0x14   :  { %1095 = vsyncadd [#allocation9], 4294961152  ;;  %v699_v0 = vld [vmem:[#allocation5 + $0x70] sm:$0xf]  ;;  %v912_v1 = vld [vmem:[#allocation5 + $0x74] sm:$0xf0] }
  0x15   :  { %v911_v2 = vld [vmem:[#allocation5 + $0x74] sm:$0xf]  ;;  %v700_v3 = vor.u32 %v912_v1, %v699_v0  ;;  %v701_v4 = vld [vmem:[#allocation5 + $0x78] sm:$0xf0]  ;;  %v691_v5 = vld [vmem:[#allocation5 + $0x60] sm:$0xf] }
  0x16   :  { %v910_v6 = vld [vmem:[#allocation5 + $0x64] sm:$0xf0]  ;;  %v704_v7 = vor.u32 %v911_v2, %v701_v4  ;;  %v909_v8 = vld [vmem:[#allocation5 + $0x64] sm:$0xf]  ;;  %v693_v9 = vld [vmem:[#allocation5 + $0x68] sm:$0xf0] }
  0x17   :  { %183 = vmatpush.bf16.msra.mxu0 %v700_v3  ;;  %v692_v10 = vor.u32 %v910_v6, %v691_v5  ;;  %v696_v11 = vor.u32 %v909_v8, %v693_v9  ;;  %v683_v12 = vld [vmem:[#allocation5 + $0x50] sm:$0xf]  ;;  %v908_v13 = vld [vmem:[#allocation5 + $0x54] sm:$0xf0]  ;;  %v907_v14 = vld [vmem:[#allocation5 + $0x54] sm:$0xf] }
  0x18   :  { %196 = vmatpush.bf16.msra.mxu1 %v704_v7  ;;  %v685_v15 = vld [vmem:[#allocation5 + $0x58] sm:$0xf0]  ;;  %v684_v16 = vor.u32 %v908_v13, %v683_v12  ;;  %v675_v18 = vld [vmem:[#allocation5 + $0x40] sm:$0xf]  ;;  %v906_v19 = vld [vmem:[#allocation5 + $0x44] sm:$0xf0] }
  0x19   :  { %v688_v17 = vor.u32 %v907_v14, %v685_v15  ;;  %v905_v20 = vld [vmem:[#allocation5 + $0x44] sm:$0xf]  ;;  %v677_v21 = vld [vmem:[#allocation5 + $0x48] sm:$0xf0]  ;;  %v667_v22 = vld [vmem:[#allocation5 + $0x30] sm:$0xf]  ;;  %v676_v24 = vor.u32 %v906_v19, %v675_v18 }
  0x1a   :  { %v904_v23 = vld [vmem:[#allocation5 + $0x34] sm:$0xf0]  ;;  %v903_v25 = vld [vmem:[#allocation5 + $0x34] sm:$0xf]  ;;  %v791_v26 = vld [vmem:[#allocation8 + $0xa8] sm:$0xf]  ;;  %v680_v29 = vor.u32 %v905_v20, %v677_v21 }
  0x1b   :  { %184 = vmatpush.bf16.msra.mxu0 %v692_v10  ;;  %v935_v27 = vld [vmem:[#allocation8 + $0xb0] sm:$0xf0]  ;;  %v887_v28 = vld [vmem:[#allocation8 + $0x168] sm:$0xf]  ;;  %v779_v32 = vld [vmem:[#allocation8 + $0x90] sm:$0xf]  ;;  %v668_v39 = vor.u32 %v904_v23, %v667_v22 }
  0x1c   :  { %197 = vmatpush.bf16.msra.mxu1 %v696_v11  ;;  %v792_v30 = vor.u32 %v935_v27, %v791_v26  ;;  %v959_v31 = vld [vmem:[#allocation8 + $0x170] sm:$0xf0]  ;;  %v932_v33 = vld [vmem:[#allocation8 + $0x98] sm:$0xf0]  ;;  %v875_v36 = vld [vmem:[#allocation8 + $0x150] sm:$0xf] }
  0x1d   :  { %v669_v34 = vld [vmem:[#allocation5 + $0x38] sm:$0xf0]  ;;  %v888_v35 = vor.u32 %v959_v31, %v887_v28  ;;  %v780_v38 = vor.u32 %v932_v33, %v779_v32  ;;  %v659_v40 = vld [vmem:[#allocation5 + $0x20] sm:$0xf]  ;;  %v929_v43 = vld [vmem:[#allocation8 + $0x80] sm:$0xf0] }
  0x1e   :  { %v956_v37 = vld [vmem:[#allocation8 + $0x158] sm:$0xf0]  ;;  %541 = vmatpush.bf16.msra.mxu2 %v792_v30  ;;  %v767_v42 = vld [vmem:[#allocation8 + $0x78] sm:$0xf]  ;;  %v672_v44 = vor.u32 %v903_v25, %v669_v34  ;;  %v902_v45 = vld [vmem:[#allocation5 + $0x24] sm:$0xf0] }
  0x1f   :  { %185 = vmatpush.bf16.msra.mxu0 %v684_v16  ;;  %554 = vmatpush.bf16.msra.mxu3 %v888_v35  ;;  %v876_v41 = vor.u32 %v956_v37, %v875_v36  ;;  %v863_v46 = vld [vmem:[#allocation8 + $0x138] sm:$0xf]  ;;  %v953_v47 = vld [vmem:[#allocation8 + $0x140] sm:$0xf0]  ;;  %v661_v49 = vld [vmem:[#allocation5 + $0x28] sm:$0xf0]  ;;  %v768_v50 = vor.u32 %v929_v43, %v767_v42  ;;  %v660_v51 = vor.u32 %v902_v45, %v659_v40 }
  0x20   :  { %198 = vmatpush.bf16.msra.mxu1 %v688_v17  ;;  %v901_v48 = vld [vmem:[#allocation5 + $0x24] sm:$0xf]  ;;  %v651_v52 = vld [vmem:[#allocation5 + $0x10] sm:$0xf]  ;;  %v864_v53 = vor.u32 %v953_v47, %v863_v46  ;;  %v900_v57 = vld [vmem:[#allocation5 + $0x14] sm:$0xf0] }
  0x21   :  { %v755_v54 = vld [vmem:[#allocation8 + $0x60] sm:$0xf]  ;;  %v926_v55 = vld [vmem:[#allocation8 + $0x68] sm:$0xf0]  ;;  %v664_v56 = vor.u32 %v901_v48, %v661_v49  ;;  %v899_v60 = vld [vmem:[#allocation5 + $0x14] sm:$0xf]  ;;  %v652_v0 = vor.u32 %v900_v57, %v651_v52 }
  0x22   :  { %542 = vmatpush.bf16.msra.mxu2 %v780_v38  ;;  %v851_v58 = vld [vmem:[#allocation8 + $0x120] sm:$0xf]  ;;  %v950_v59 = vld [vmem:[#allocation8 + $0x128] sm:$0xf0]  ;;  %v653_v61 = vld [vmem:[#allocation5 + $0x18] sm:$0xf0]  ;;  %v756_v63 = vor.u32 %v926_v55, %v755_v54 }
  0x23   :  { %186 = vmatpush.bf16.msra.mxu0 %v676_v24  ;;  %555 = vmatpush.bf16.msra.mxu3 %v876_v41  ;;  %v643_v62 = vld [vmem:[#allocation5] sm:$0xf]  ;;  %v898_v1 = vld [vmem:[#allocation5 + $0x4] sm:$0xf0]  ;;  %v852_v2 = vor.u32 %v950_v59, %v851_v58  ;;  %v923_v4 = vld [vmem:[#allocation8 + $0x50] sm:$0xf0]  ;;  %v656_v5 = vor.u32 %v899_v60, %v653_v61 }
  0x24   :  { %199 = vmatpush.bf16.msra.mxu1 %v680_v29  ;;  %v743_v3 = vld [vmem:[#allocation8 + $0x48] sm:$0xf]  ;;  %v897_v6 = vld [vmem:[#allocation5 + $0x4] sm:$0xf]  ;;  %v947_v8 = vld [vmem:[#allocation8 + $0x110] sm:$0xf0]  ;;  %v644_v15 = vor.u32 %v898_v1, %v643_v62 }
  0x25   :  { %v839_v7 = vld [vmem:[#allocation8 + $0x108] sm:$0xf]  ;;  %v934_v10 = vld [vmem:[#allocation8 + $0xac] sm:$0xf]  ;;  %v793_v11 = vld [vmem:[#allocation8 + $0xb4] sm:$0xf0]  ;;  %v744_v14 = vor.u32 %v923_v4, %v743_v3 }
  0x26   :  { %543 = vmatpush.bf16.msra.mxu2 %v768_v50  ;;  %v645_v9 = vld [vmem:[#allocation5 + $0x8] sm:$0xf0]  ;;  %v889_v13 = vld [vmem:[#allocation8 + $0x174] sm:$0xf0]  ;;  %v840_v16 = vor.u32 %v947_v8, %v839_v7  ;;  %v731_v17 = vld [vmem:[#allocation8 + $0x30] sm:$0xf]  ;;  %v796_v20 = vor.u32 %v934_v10, %v793_v11 }
  0x27   :  { %187 = vmatpush.bf16.msra.mxu0 %v668_v39  ;;  %556 = vmatpush.bf16.msra.mxu3 %v864_v53  ;;  %v958_v12 = vld [vmem:[#allocation8 + $0x16c] sm:$0xf]  ;;  %v920_v18 = vld [vmem:[#allocation8 + $0x38] sm:$0xf0]  ;;  %v648_v19 = vor.u32 %v897_v6, %v645_v9  ;;  %v827_v21 = vld [vmem:[#allocation8 + $0xf0] sm:$0xf] }
  0x28   :  { %200 = vmatpush.bf16.msra.mxu1 %v672_v44  ;;  %v944_v22 = vld [vmem:[#allocation8 + $0xf8] sm:$0xf0]  ;;  %v892_v23 = vor.u32 %v958_v12, %v889_v13  ;;  %v931_v24 = vld [vmem:[#allocation8 + $0x94] sm:$0xf]  ;;  %v781_v25 = vld [vmem:[#allocation8 + $0x9c] sm:$0xf0]  ;;  %v732_v28 = vor.u32 %v920_v18, %v731_v17 }
  0x29   :  { %v955_v26 = vld [vmem:[#allocation8 + $0x154] sm:$0xf]  ;;  %v877_v27 = vld [vmem:[#allocation8 + $0x15c] sm:$0xf0]  ;;  %v80_v29 = vld [vmem:[#allocation2] sm:$0xf]  ;;  %v828_v30 = vor.u32 %v944_v22, %v827_v21  ;;  %v784_v33 = vor.u32 %v931_v24, %v781_v25 }
  0x2a   :  { %544 = vmatpush.bf16.msra.mxu2 %v756_v63  ;;  %v719_v31 = vld [vmem:[#allocation8 + $0x18] sm:$0xf]  ;;  %v917_v32 = vld [vmem:[#allocation8 + $0x20] sm:$0xf0]  ;;  %v880_v36 = vor.u32 %v955_v26, %v877_v27  ;;  %v928_v37 = vld [vmem:[#allocation8 + $0x7c] sm:$0xf] }
  0x2b   :  { %188 = vmatpush.bf16.msra.mxu0 %v660_v51  ;;  %557 = vmatpush.bf16.msra.mxu3 %v852_v2  ;;  %v815_v34 = vld [vmem:[#allocation8 + $0xd8] sm:$0xf]  ;;  %v941_v35 = vld [vmem:[#allocation8 + $0xe0] sm:$0xf0]  ;;  %v769_v38 = vld [vmem:[#allocation8 + $0x84] sm:$0xf0]  ;;  %v720_v41 = vor.u32 %v917_v32, %v719_v31 }
  0x2c   :  { %201 = vmatpush.bf16.msra.mxu1 %v664_v56  ;;  %v952_v39 = vld [vmem:[#allocation8 + $0x13c] sm:$0xf]  ;;  %v865_v40 = vld [vmem:[#allocation8 + $0x144] sm:$0xf0]  ;;  %v816_v42 = vor.u32 %v941_v35, %v815_v34  ;;  %v925_v43 = vld [vmem:[#allocation8 + $0x64] sm:$0xf]  ;;  %v772_v47 = vor.u32 %v928_v37, %v769_v38 }
  0x2d   :  { %v707_v44 = vld [vmem:[#allocation8] sm:$0xf]  ;;  %v914_v45 = vld [vmem:[#allocation8 + $0x8] sm:$0xf0]  ;;  %v799_v49 = vld [vmem:[#allocation8 + $0xb0] sm:$0xf]  ;;  %v868_v51 = vor.u32 %v952_v39, %v865_v40 }
  0x2e   :  { %545 = vmatpush.bf16.msra.mxu2 %v744_v14  ;;  %v803_v46 = vld [vmem:[#allocation8 + $0xc0] sm:$0xf]  ;;  %v938_v48 = vld [vmem:[#allocation8 + $0xc8] sm:$0xf0]  ;;  %v936_v50 = vld [vmem:[#allocation8 + $0xb8] sm:$0xf0]  ;;  %v708_v57 = vor.u32 %v914_v45, %v707_v44 }
  0x2f   :  { %189 = vmatpush.bf16.msra.mxu0 %v652_v0  ;;  %558 = vmatpush.bf16.msra.mxu3 %v840_v16  ;;  %v757_v52 = vld [vmem:[#allocation8 + $0x6c] sm:$0xf0]  ;;  %v960_v54 = vld [vmem:[#allocation8 + $0x178] sm:$0xf0]  ;;  %v949_v55 = vld [vmem:[#allocation8 + $0x124] sm:$0xf]  ;;  %v804_v58 = vor.u32 %v938_v48, %v803_v46  ;;  %v800_v59 = vor.u32 %v936_v50, %v799_v49 }
  0x30   :  { %202 = vmatpush.bf16.msra.mxu1 %v656_v5  ;;  %v895_v53 = vld [vmem:[#allocation8 + $0x170] sm:$0xf]  ;;  %v760_v60 = vor.u32 %v925_v43, %v757_v52  ;;  %v922_v61 = vld [vmem:[#allocation8 + $0x4c] sm:$0xf]  ;;  %v787_v63 = vld [vmem:[#allocation8 + $0x98] sm:$0xf] }
  0x31   :  { %v853_v56 = vld [vmem:[#allocation8 + $0x12c] sm:$0xf0]  ;;  %v896_v62 = vor.u32 %v960_v54, %v895_v53  ;;  %v933_v0 = vld [vmem:[#allocation8 + $0xa0] sm:$0xf0]  ;;  %v745_v2 = vld [vmem:[#allocation8 + $0x54] sm:$0xf0] }
  0x32   :  { %546 = vmatpush.bf16.msra.mxu2 %v732_v28  ;;  %v856_v1 = vor.u32 %v949_v55, %v853_v56  ;;  %v883_v3 = vld [vmem:[#allocation8 + $0x158] sm:$0xf]  ;;  %v957_v4 = vld [vmem:[#allocation8 + $0x160] sm:$0xf0]  ;;  %v946_v5 = vld [vmem:[#allocation8 + $0x10c] sm:$0xf]  ;;  %v788_v7 = vor.u32 %v933_v0, %v787_v63  ;;  %v748_v8 = vor.u32 %v922_v61, %v745_v2 }
  0x33   :  { %190 = vmatpush.bf16.msra.mxu0 %v644_v15  ;;  %559 = vmatpush.bf16.msra.mxu3 %v828_v30  ;;  %v841_v6 = vld [vmem:[#allocation8 + $0x114] sm:$0xf0]  ;;  %v884_v9 = vor.u32 %v957_v4, %v883_v3  ;;  %v919_v11 = vld [vmem:[#allocation8 + $0x34] sm:$0xf]  ;;  %v733_v12 = vld [vmem:[#allocation8 + $0x3c] sm:$0xf0] }
  0x34   :  { %203 = vmatpush.bf16.msra.mxu1 %v648_v19  ;;  %v844_v10 = vor.u32 %v946_v5, %v841_v6  ;;  %v943_v13 = vld [vmem:[#allocation8 + $0xf4] sm:$0xf]  ;;  %v829_v14 = vld [vmem:[#allocation8 + $0xfc] sm:$0xf0]  ;;  %v736_v15 = vor.u32 %v919_v11, %v733_v12  ;;  %v916_v17 = vld [vmem:[#allocation8 + $0x1c] sm:$0xf] }
  0x35   :  { %v832_v16 = vor.u32 %v943_v13, %v829_v14  ;;  %v721_v18 = vld [vmem:[#allocation8 + $0x24] sm:$0xf0]  ;;  %v940_v19 = vld [vmem:[#allocation8 + $0xdc] sm:$0xf]  ;;  %v775_v22 = vld [vmem:[#allocation8 + $0x80] sm:$0xf] }
  0x36   :  { %191 = vmatmul.bf16.vlgmr.msra.gmra.mxu0 %v80_v29  ;;  %547 = vmatpush.bf16.msra.mxu2 %v720_v41  ;;  %v817_v21 = vld [vmem:[#allocation8 + $0xe4] sm:$0xf0]  ;;  %v871_v26 = vld [vmem:[#allocation8 + $0x140] sm:$0xf]  ;;  %v954_v27 = vld [vmem:[#allocation8 + $0x148] sm:$0xf0] }
  0x37   :  { %567 = vmatpush.bf16.msrb.mxu0 %v796_v20  ;;  %204 = vmatmul.bf16.vlgmr.msra.gmra.mxu1 %v80_v29  ;;  %v724_v20 = vor.u32 %v916_v17, %v721_v18  ;;  %v820_v24 = vor.u32 %v940_v19, %v817_v21  ;;  %v872_v28 = vor.u32 %v954_v27, %v871_v26  ;;  %v913_v29 = vld [vmem:[#allocation8 + $0x4] sm:$0xf]  ;;  %v709_v30 = vld [vmem:[#allocation8 + $0xc] sm:$0xf0]  ;;  %v763_v34 = vld [vmem:[#allocation8 + $0x68] sm:$0xf] }
  0x38   :  { %580 = vmatpush.bf16.msrb.mxu1 %v892_v23  ;;  %560 = vmatpush.bf16.msra.mxu3 %v816_v42  ;;  %v930_v23 = vld [vmem:[#allocation8 + $0x88] sm:$0xf0]  ;;  %v937_v31 = vld [vmem:[#allocation8 + $0xc4] sm:$0xf]  ;;  %v712_v32 = vor.u32 %v913_v29, %v709_v30  ;;  %v927_v35 = vld [vmem:[#allocation8 + $0x70] sm:$0xf0] }
  0x39   :  { %v776_v25 = vor.u32 %v930_v23, %v775_v22  ;;  %v764_v37 = vor.u32 %v927_v35, %v763_v34  ;;  %v859_v38 = vld [vmem:[#allocation8 + $0x128] sm:$0xf]  ;;  %v951_v39 = vld [vmem:[#allocation8 + $0x130] sm:$0xf0]  ;;  %v751_v41 = vld [vmem:[#allocation8 + $0x50] sm:$0xf] }
  0x3a   :  { %548 = vmatpush.bf16.msra.mxu2 %v708_v57  ;;  %v860_v40 = vor.u32 %v951_v39, %v859_v38  ;;  %v924_v42 = vld [vmem:[#allocation8 + $0x58] sm:$0xf0]  ;;  %v847_v43 = vld [vmem:[#allocation8 + $0x110] sm:$0xf]  ;;  %v921_v48 = vld [vmem:[#allocation8 + $0x40] sm:$0xf0] }
  0x3b   :  { %568 = vmatpush.bf16.msrb.mxu0 %v784_v33  ;;  %v805_v33 = vld [vmem:[#allocation8 + $0xcc] sm:$0xf0]  ;;  %v752_v44 = vor.u32 %v924_v42, %v751_v41  ;;  %v948_v45 = vld [vmem:[#allocation8 + $0x118] sm:$0xf0]  ;;  %v835_v49 = vld [vmem:[#allocation8 + $0xf8] sm:$0xf] }
  0x3c   :  { %581 = vmatpush.bf16.msrb.mxu1 %v880_v36  ;;  %561 = vmatpush.bf16.msra.mxu3 %v804_v58  ;;  %v808_v36 = vor.u32 %v937_v31, %v805_v33  ;;  %v848_v46 = vor.u32 %v948_v45, %v847_v43  ;;  %v727_v53 = vld [vmem:[#allocation8 + $0x20] sm:$0xf]  ;;  %v918_v54 = vld [vmem:[#allocation8 + $0x28] sm:$0xf0]  ;;  %v811_v61 = vld [vmem:[#allocation8 + $0xc8] sm:$0xf] }
  0x3d   :  { %v823_v55 = vld [vmem:[#allocation8 + $0xe0] sm:$0xf]  ;;  %v942_v56 = vld [vmem:[#allocation8 + $0xe8] sm:$0xf0]  ;;  %v728_v57 = vor.u32 %v918_v54, %v727_v53  ;;  %v277_v14 = vld [vmem:[%s1159_s4] sm:$0x7] }
  0x3e   :  { %593 = vmatpush.bf16.msrb.mxu2 %v800_v59  ;;  %v824_v58 = vor.u32 %v942_v56, %v823_v55  ;;  %v715_v59 = vld [vmem:[#allocation8 + $0x8] sm:$0xf]  ;;  %v281_v29 = vperm.slane %v277_v14, 2  ;;  %s1106_s15 = smov [#allocation10]   ;;  %s629_s18 = sshll.u32 %s1160_s5, 4  ;;  %s630_s18 = int_to_ptr.hbm [resolvable:$true] %s629_s18 }
  0x3f   :  { %569 = vmatpush.bf16.msrb.mxu0 %v772_v47  ;;  %v739_v47 = vld [vmem:[#allocation8 + $0x38] sm:$0xf]  ;;  %s627_s4 = sshll.u32 %s1106_s15, 4  ;;  %s628_s4 = int_to_ptr.vmem [resolvable:$true] %s627_s4 }
  0x40   :  { %582 = vmatpush.bf16.msrb.mxu1 %v868_v51  ;;  %606 = vmatpush.bf16.msrb.mxu3 %v896_v62  ;;  %v740_v50 = vor.u32 %v921_v48, %v739_v47  ;;  %v945_v51 = vld [vmem:[#allocation8 + $0x100] sm:$0xf0]  ;;  %v939_v62 = vld [vmem:[#allocation8 + $0xd0] sm:$0xf0] }
  0x41   :  { %v836_v52 = vor.u32 %v945_v51, %v835_v49  ;;  %v812_v0 = vor.u32 %v939_v62, %v811_v61 }
  0x42   :  { %594 = vmatpush.bf16.msrb.mxu2 %v788_v7 }
  0x43   :  { %570 = vmatpush.bf16.msrb.mxu0 %v760_v60  ;;  %v915_v60 = vld [vmem:[#allocation8 + $0x10] sm:$0xf0] }
  0x44   :  { %583 = vmatpush.bf16.msrb.mxu1 %v856_v1  ;;  %607 = vmatpush.bf16.msrb.mxu3 %v884_v9  ;;  %v716_v63 = vor.u32 %v915_v60, %v715_v59  ;;  %v97_v1 = vld [vmem:[#allocation7] sm:$0x3] }
  0x45   :  { %v99_v2 = vperm.slane %v97_v1, 0  ;;  %v100_v3 = vperm.slane %v97_v1, 1 }
  0x46   :  { %595 = vmatpush.bf16.msrb.mxu2 %v776_v25 }
  0x47   :  { %571 = vmatpush.bf16.msrb.mxu0 %v748_v8 }
  0x48   :  { %584 = vmatpush.bf16.msrb.mxu1 %v844_v10  ;;  %608 = vmatpush.bf16.msrb.mxu3 %v872_v28 }
  0x4a   :  { %596 = vmatpush.bf16.msrb.mxu2 %v764_v37 }
  0x4b   :  { %572 = vmatpush.bf16.msrb.mxu0 %v736_v15  ;;  %v280_v15 = vperm.slane %v277_v14, 1 }
  0x4c   :  { %585 = vmatpush.bf16.msrb.mxu1 %v832_v16  ;;  %609 = vmatpush.bf16.msrb.mxu3 %v860_v40 }
  0x4e   :  { %597 = vmatpush.bf16.msrb.mxu2 %v752_v44 }
  0x4f   :  { %573 = vmatpush.bf16.msrb.mxu0 %v724_v20  ;;  %v279_v20 = vperm.slane %v277_v14, 0 }
  0x50   :  { %586 = vmatpush.bf16.msrb.mxu1 %v820_v24  ;;  %610 = vmatpush.bf16.msrb.mxu3 %v848_v46 }
  0x52   :  { %598 = vmatpush.bf16.msrb.mxu2 %v740_v50 }
  0x53   :  { %574 = vmatpush.bf16.msrb.mxu0 %v712_v32 }
  0x54   :  { %587 = vmatpush.bf16.msrb.mxu1 %v808_v36  ;;  %611 = vmatpush.bf16.msrb.mxu3 %v836_v52 }
  0x56   :  { %599 = vmatpush.bf16.msrb.mxu2 %v728_v57 }
  0x58   :  { %612 = vmatpush.bf16.msrb.mxu3 %v824_v58 }
  0x5a   :  { %600 = vmatpush.bf16.msrb.mxu2 %v716_v63 }
  0x5c   :  { %613 = vmatpush.bf16.msrb.mxu3 %v812_v0 }
  0xb3   :  { %v192_v4 = vpop.f32.mrf.mxu0 }
  0xb4   :  { %v193_v5 = vadd.f32 %v192_v4, %v99_v2  ;;  %v205_v6 = vpop.f32.mrf.mxu1 }
  0xb5   :  { %v206_v7 = vadd.f32 %v205_v6, %v100_v3 }
  0xb6   :  { %v209_v8 = vmax.f32 %v193_v5, 0.0 }
  0xb7   :  { %v210_v9 = vmax.f32 %v206_v7, 0.0 }
  0xb8   :  { %v211_v10 = vpack.c.bf16 %v209_v8, %v209_v8 }
  0xb9   :  { %v212_v11 = vpack.c.bf16 %v210_v9, %v210_v9 }
  0xba   :  { %549 = vmatmul.bf16.vlgmr.msra.gmra.mxu2 %v211_v10  ;;  %575 = vmatmul.bf16.vlgmr.msrb.gmra.mxu0 %v211_v10 }
  0xbb   :  { %562 = vmatmul.bf16.vlgmr.msra.gmra.mxu3 %v212_v11  ;;  %588 = vmatmul.bf16.vlgmr.msrb.gmra.mxu1 %v212_v11  ;;  %v194_v12 = vpop.f32.mrf.mxu0 }
  0xbc   :  { %v207_v13 = vpop.f32.mrf.mxu1 }
  0xca   :  { %601 = vmatmul.bf16.vlgmr.msrb.gmra.mxu2 %v211_v10 }
  0xcb   :  { %614 = vmatmul.bf16.vlgmr.msrb.gmra.mxu3 %v212_v11 }
 0x137   :  { %v576_v16 = vpop.f32.mrf.mxu0 }
 0x138   :  { %v577_v17 = vadd.f32 %v576_v16, %v280_v15  ;;  %v589_v18 = vpop.f32.mrf.mxu1 }
 0x13a   :  { %v590_v19 = vadd.f32 %v589_v18, %v577_v17 }
 0x13c   :  { %620 = vst [vmem:[#allocation10 + $0x8] sm:$0xff] %v590_v19 }
 0x13d   :  { %v550_v21 = vpop.f32.mrf.mxu2 }
 0x13e   :  { %v551_v22 = vadd.f32 %v550_v21, %v279_v20  ;;  %v563_v23 = vpop.f32.mrf.mxu3 }
 0x13f   :  { %v578_v24 = vpop.f32.mrf.mxu0 }
 0x140   :  { %v564_v25 = vadd.f32 %v563_v23, %v551_v22  ;;  %v591_v26 = vpop.f32.mrf.mxu1 }
 0x142   :  { %619 = vst [vmem:[#allocation10] sm:$0xff] %v564_v25 }
 0x145   :  { %v552_v27 = vpop.f32.mrf.mxu2 }
 0x146   :  { %v565_v28 = vpop.f32.mrf.mxu3 }
 0x14d   :  { %v602_v30 = vpop.f32.mrf.mxu2 }
 0x14e   :  { %v603_v31 = vadd.f32 %v602_v30, %v281_v29  ;;  %v615_v32 = vpop.f32.mrf.mxu3 }
 0x150   :  { %v616_v33 = vadd.f32 %v615_v32, %v603_v31 }
 0x152   :  { %621 = vst [vmem:[#allocation10 + $0x10] sm:$0xff] %v616_v33 }
 0x153   :  { %632 = dma.vmem_to_hbm [thread:$0]  %s628_s4, 384, %s630_s18, [#allocation4]  }
 0x155   :  { %v604_v34 = vpop.f32.mrf.mxu2 }
 0x156   :  { %v617_v35 = vpop.f32.mrf.mxu3 }
 0x157   :  { %1096 = dma.done.wait [#allocation4], 384  }
 0x158   :  { %1097 = vsyncadd [#allocation4], 4294966912 }
 0x159   :  { %637 = vsyncpa [#allocation3], 1 }
 0x15a   :  { %638 = vsyncpa [#allocation6], 1 }
 0x15b   :  { %639 = vsyncpa [#allocation9], 1 }
 0x15c   :  { %640 = vsyncpa [#allocation4], 1 }

</bundles_post_ra>
